<compile_context>
chip_gen: v7x
topology: tpu7x:2x2x1
jax: 0.10.0
libtpu: 0.0.40
codegen_flags: <defaults>
</compile_context>

<pallas_src>
import functools

import numpy as np
import jax
import jax.numpy as jnp
from jax.experimental import pallas as pl
from jax.experimental.pallas import tpu as pltpu


def _yolo_kernel(pred_ref, off_ref, out_ref, *, stride, anchors_np):
    # pred_ref : (C5, GG)  raw conv outputs for one (sample, anchor), native dtype
    # off_ref  : (2,  GG)  rows = [grid_x * stride, grid_y * stride]
    # out_ref  : (GG, C5)  decoded boxes/conf/class probs (PyTorch layout)
    C5, GG = pred_ref.shape
    A = anchors_np.shape[0]

    # anchor w/h for this grid step (raw anchors: (a/stride)*stride == a);
    # scalar selects on pl.program_id -> no per-anchor Python unroll of the tile math.
    a_id = pl.program_id(1)
    aw = jnp.float32(anchors_np[A - 1, 0])
    ah = jnp.float32(anchors_np[A - 1, 1])
    for i in range(A - 2, -1, -1):
        aw = jnp.where(a_id == i, jnp.float32(anchors_np[i, 0]), aw)
        ah = jnp.where(a_id == i, jnp.float32(anchors_np[i, 1]), ah)

    p = pred_ref[...].astype(jnp.float32)            # in-kernel upcast (bf16 ok)
    off = off_ref[...]                               # (2, GG), already * stride
    gx = off[0:1, :]                                 # (1, GG) grid_x * stride
    gy = off[1:2, :]                                 # (1, GG) grid_y * stride

    row = jax.lax.broadcasted_iota(jnp.int32, (C5, GG), 0)
    is_exp = jnp.logical_and(row >= 2, row <= 3)     # rows 2,3 -> exp(w|h)*anchor

    # single transcendental pipeline: e = exp(p) on exp rows, exp(-p) elsewhere;
    # sigmoid(p) = 1 / (1 + exp(-p))  ->  1 exp + 1 reciprocal per element total.
    e = jnp.exp(jnp.where(is_exp, p, -p))
    sig = 1.0 / (1.0 + e)

    exp_scale = jnp.where(row == 2, aw, ah)
    sig_scale = jnp.where(row <= 1, jnp.float32(stride), jnp.float32(1.0))
    add = jnp.where(row == 0, gx, jnp.where(row == 1, gy, jnp.float32(0.0)))

    dec = jnp.where(is_exp, e * exp_scale, sig * sig_scale + add)   # (C5, GG)

    # fused layout transform: XLU transpose -> (GG, C5) PyTorch layout.
    pad = (-C5) % 8
    if pad:
        # single aligned zero-pad (no extra EUP work) to keep the transpose
        # source sublane-aligned; pad lanes sliced off at the store.
        dec = jnp.concatenate([dec, jnp.zeros((pad, GG), jnp.float32)], axis=0)
        out_ref[...] = dec.T[:, :C5].astype(out_ref.dtype)
    else:
        out_ref[...] = dec.T.astype(out_ref.dtype)


@functools.lru_cache(maxsize=None)
def _grid_offsets(grid_size, img_dim):
    # host-side constant: [grid_x, grid_y] flattened row-major, pre-scaled by stride
    stride = float(img_dim) / float(grid_size)
    gx = np.tile(np.arange(grid_size, dtype=np.float32), grid_size)
    gy = np.repeat(np.arange(grid_size, dtype=np.float32), grid_size)
    return np.stack([gx, gy], axis=0) * stride        # (2, G*G)


def yolo_layer_forward(x, anchors, num_classes, img_dim=416,
                       out_dtype=jnp.float32):
    """Equivalent of YOLOLayer.forward(x, targets=None, img_dim=img_dim)."""
    N, Cin, G, G2 = x.shape
    assert G == G2, "expects square feature map"
    anchors_np = np.asarray(anchors, dtype=np.float32)          # (A, 2) constants
    A = anchors_np.shape[0]
    C5 = num_classes + 5
    assert Cin == A * C5
    GG = G * G
    stride = float(img_dim) / float(G)

    # (N, A*(5+C), G, G) -> (N, A, 5+C, G*G): free reshape, native dtype.
    pred = x.reshape(N, A, C5, GG)
    offsets = jnp.asarray(_grid_offsets(G, img_dim))            # (2, GG), tiny

    kernel = functools.partial(_yolo_kernel, stride=stride, anchors_np=anchors_np)

    elems = N * A * C5 * GG
    cost = pl.CostEstimate(
        flops=10 * elems,
        transcendentals=2 * elems,
        bytes_accessed=elems * (x.dtype.itemsize + np.dtype(out_dtype).itemsize)
        + 2 * GG * 4)

    out = pl.pallas_call(
        kernel,
        out_shape=jax.ShapeDtypeStruct((N, A, GG, C5), out_dtype),
        grid=(N, A),
        in_specs=[
            pl.BlockSpec((None, None, C5, GG), lambda n, a: (n, a, 0, 0)),
            pl.BlockSpec((2, GG), lambda n, a: (0, 0)),
        ],
        out_specs=pl.BlockSpec((None, None, GG, C5), lambda n, a: (n, a, 0, 0)),
        compiler_params=pltpu.CompilerParams(
            dimension_semantics=("parallel", "parallel"),
            vmem_limit_bytes=32 * 1024 * 1024),
        cost_estimate=cost,
    )(pred, offsets)

    # (N, A, GG, 5+C) -> (N, A*GG, 5+C): contiguous reshape only (no transpose).
    output = out.reshape(N, A * GG, C5)
    # targets is None -> PyTorch returns (output, 0)
    # TODO(synk): training branch (build_targets + masked MSE/BCE losses) needs
    # data-dependent boolean-mask gathers with dynamic sizes; not implemented.
    return output, 0


def yolo_reference(x, anchors, num_classes, img_dim=416):
    """Pure-JAX transcription of the PyTorch forward, for verification."""
    N, Cin, G, _ = x.shape
    A = anchors.shape[0]
    C5 = num_classes + 5
    stride = img_dim / G
    pred = x.reshape(N, A, C5, G, G).transpose(0, 1, 3, 4, 2)   # (N,A,G,G,C5)
    sx = jax.nn.sigmoid(pred[..., 0])
    sy = jax.nn.sigmoid(pred[..., 1])
    w = pred[..., 2]
    h = pred[..., 3]
    conf = jax.nn.sigmoid(pred[..., 4])
    cls = jax.nn.sigmoid(pred[..., 5:])
    grid_x = jnp.tile(jnp.arange(G, dtype=jnp.float32), (G, 1)).reshape(1, 1, G, G)
    grid_y = jnp.tile(jnp.arange(G, dtype=jnp.float32), (G, 1)).T.reshape(1, 1, G, G)
    scaled = anchors / stride
    aw = scaled[:, 0].reshape(1, A, 1, 1)
    ah = scaled[:, 1].reshape(1, A, 1, 1)
    boxes = jnp.stack(
        [sx + grid_x, sy + grid_y, jnp.exp(w) * aw, jnp.exp(h) * ah], axis=-1)
    out = jnp.concatenate(
        [boxes.reshape(N, -1, 4) * stride,
         conf.reshape(N, -1, 1),
         cls.reshape(N, -1, num_classes)], axis=-1)
    return out


if __name__ == "__main__":
    key = jax.random.PRNGKey(0)
    N, A, num_classes, G = 2, 3, 2, 16
    anchors = jnp.array([[10.0, 13.0], [16.0, 30.0], [33.0, 23.0]],
                        dtype=jnp.float32)
    x = jax.random.normal(key, (N, A * (num_classes + 5), G, G),
                          dtype=jnp.float32)

    # f32 input path
    out, _ = yolo_layer_forward(x, anchors, num_classes, img_dim=416)
    out = jax.block_until_ready(out)
    ref = yolo_reference(x, anchors, num_classes, img_dim=416)
    assert out.shape == (N, A * G * G, num_classes + 5), out.shape
    assert jnp.allclose(out, ref, atol=1e-4, rtol=1e-4), \
        float(jnp.max(jnp.abs(out - ref)))

    # bf16 input path (in-kernel upcast to f32, f32 output)
    x_bf16 = x.astype(jnp.bfloat16)
    out_bf, _ = yolo_layer_forward(x_bf16, anchors, num_classes, img_dim=416)
    out_bf = jax.block_until_ready(out_bf)
    ref_bf = yolo_reference(x_bf16.astype(jnp.float32), anchors, num_classes,
                            img_dim=416)
    assert jnp.allclose(out_bf, ref_bf, atol=1e-3, rtol=1e-3), \
        float(jnp.max(jnp.abs(out_bf - ref_bf)))

    print("KERNEL_OK")
</pallas_src>

<mosaic_0001>
module attributes {stable_mosaic.version = 11 : i64} {
  func.func @_yolo_kernel(%arg0: i32, %arg1: i32, %arg2: memref<1x1x7x256xf32, #tpu.memory_space<vmem>>, %arg3: memref<2x256xf32, #tpu.memory_space<vmem>>, %arg4: memref<1x1x256x7xf32, #tpu.memory_space<vmem>>) attributes {dimension_semantics = [#tpu.dimension_semantics<parallel>, #tpu.dimension_semantics<parallel>], iteration_bounds = array<i64: 2, 3>, scalar_prefetch = 0 : i64, scratch_operands = 0 : i64, tpu.core_type = #tpu.core_type<tc>, window_params = [{transform_indices = @transform_0, window_bounds = array<i64: 1, 1, 7, 256>}, {pipeline_mode = #tpu.pipeline_mode<synchronous>, transform_indices = @transform_1, window_bounds = array<i64: 2, 256>}, {transform_indices = @transform_2, window_bounds = array<i64: 1, 1, 256, 7>}]} {
    %c1_i32 = arith.constant 1 : i32
    %0 = arith.cmpi eq, %arg1, %c1_i32 : i32
    %cst = arith.constant 1.600000e+01 : f32
    %cst_0 = arith.constant 3.300000e+01 : f32
    %1 = arith.select %0, %cst, %cst_0 : f32
    %c1_i32_1 = arith.constant 1 : i32
    %2 = arith.cmpi eq, %arg1, %c1_i32_1 : i32
    %cst_2 = arith.constant 3.000000e+01 : f32
    %cst_3 = arith.constant 2.300000e+01 : f32
    %3 = arith.select %2, %cst_2, %cst_3 : f32
    %c0_i32 = arith.constant 0 : i32
    %4 = arith.cmpi eq, %arg1, %c0_i32 : i32
    %cst_4 = arith.constant 1.000000e+01 : f32
    %5 = arith.select %4, %cst_4, %1 : f32
    %c0_i32_5 = arith.constant 0 : i32
    %6 = arith.cmpi eq, %arg1, %c0_i32_5 : i32
    %cst_6 = arith.constant 1.300000e+01 : f32
    %7 = arith.select %6, %cst_6, %3 : f32
    %c0 = arith.constant 0 : index
    %c0_7 = arith.constant 0 : index
    %c0_8 = arith.constant 0 : index
    %c0_9 = arith.constant 0 : index
    %8 = vector.load %arg2[%c0, %c0_7, %c0_8, %c0_9] : memref<1x1x7x256xf32, #tpu.memory_space<vmem>>, vector<1x1x7x256xf32>
    %9 = vector.shape_cast %8 : vector<1x1x7x256xf32> to vector<7x256xf32>
    %c0_10 = arith.constant 0 : index
    %c0_11 = arith.constant 0 : index
    %10 = vector.load %arg3[%c0_10, %c0_11] : memref<2x256xf32, #tpu.memory_space<vmem>>, vector<2x256xf32>
    %11 = vector.extract_strided_slice %10 {offsets = [0, 0], sizes = [1, 256], strides = [1, 1]} : vector<2x256xf32> to vector<1x256xf32>
    %12 = vector.extract_strided_slice %10 {offsets = [1, 0], sizes = [1, 256], strides = [1, 1]} : vector<2x256xf32> to vector<1x256xf32>
    %13 = tpu.iota {dimensions = array<i32: 0>} : vector<7x256xi32>
    %c2_i32 = arith.constant 2 : i32
    %14 = vector.broadcast %c2_i32 : i32 to vector<7x256xi32>
    %15 = arith.cmpi sge, %13, %14 : vector<7x256xi32>
    %c3_i32 = arith.constant 3 : i32
    %16 = vector.broadcast %c3_i32 : i32 to vector<7x256xi32>
    %17 = arith.cmpi sle, %13, %16 : vector<7x256xi32>
    %18 = arith.andi %15, %17 : vector<7x256xi1>
    %cst_12 = arith.constant 0.000000e+00 : f32
    %19 = vector.broadcast %cst_12 : f32 to vector<7x256xf32>
    %20 = arith.subf %19, %9 : vector<7x256xf32>
    %21 = arith.select %18, %9, %20 : vector<7x256xi1>, vector<7x256xf32>
    %22 = math.exp %21 : vector<7x256xf32>
    %cst_13 = arith.constant 1.000000e+00 : f32
    %23 = vector.broadcast %cst_13 : f32 to vector<7x256xf32>
    %24 = arith.addf %23, %22 : vector<7x256xf32>
    %cst_14 = arith.constant 1.000000e+00 : f32
    %25 = vector.broadcast %cst_14 : f32 to vector<7x256xf32>
    %26 = arith.divf %25, %24 : vector<7x256xf32>
    %c2_i32_15 = arith.constant 2 : i32
    %27 = vector.broadcast %c2_i32_15 : i32 to vector<7x256xi32>
    %28 = arith.cmpi eq, %13, %27 : vector<7x256xi32>
    %29 = vector.broadcast %5 : f32 to vector<7x256xf32>
    %30 = vector.broadcast %7 : f32 to vector<7x256xf32>
    %31 = arith.select %28, %29, %30 : vector<7x256xi1>, vector<7x256xf32>
    %c1_i32_16 = arith.constant 1 : i32
    %32 = vector.broadcast %c1_i32_16 : i32 to vector<7x256xi32>
    %33 = arith.cmpi sle, %13, %32 : vector<7x256xi32>
    %cst_17 = arith.constant 2.600000e+01 : f32
    %cst_18 = arith.constant 1.000000e+00 : f32
    %34 = vector.broadcast %cst_17 : f32 to vector<7x256xf32>
    %35 = vector.broadcast %cst_18 : f32 to vector<7x256xf32>
    %36 = arith.select %33, %34, %35 : vector<7x256xi1>, vector<7x256xf32>
    %c0_i32_19 = arith.constant 0 : i32
    %37 = vector.broadcast %c0_i32_19 : i32 to vector<7x256xi32>
    %38 = arith.cmpi eq, %13, %37 : vector<7x256xi32>
    %c1_i32_20 = arith.constant 1 : i32
    %39 = vector.broadcast %c1_i32_20 : i32 to vector<7x256xi32>
    %40 = arith.cmpi eq, %13, %39 : vector<7x256xi32>
    %cst_21 = arith.constant 0.000000e+00 : f32
    %41 = vector.shape_cast %12 : vector<1x256xf32> to vector<1x256xf32>
    %42 = vector.broadcast %41 : vector<1x256xf32> to vector<7x256xf32>
    %43 = vector.broadcast %cst_21 : f32 to vector<7x256xf32>
    %44 = arith.select %40, %42, %43 : vector<7x256xi1>, vector<7x256xf32>
    %45 = vector.shape_cast %11 : vector<1x256xf32> to vector<1x256xf32>
    %46 = vector.broadcast %45 : vector<1x256xf32> to vector<7x256xf32>
    %47 = arith.select %38, %46, %44 : vector<7x256xi1>, vector<7x256xf32>
    %48 = arith.mulf %22, %31 : vector<7x256xf32>
    %49 = arith.mulf %26, %36 : vector<7x256xf32>
    %50 = arith.addf %49, %47 : vector<7x256xf32>
    %51 = arith.select %18, %48, %50 : vector<7x256xi1>, vector<7x256xf32>
    %cst_22 = arith.constant 0.000000e+00 : f32
    %52 = vector.broadcast %cst_22 : f32 to vector<1x256xf32>
    %53 = tpu.concatenate %51, %52 in 0 : vector<7x256xf32>, vector<1x256xf32> -> vector<8x256xf32>
    %54 = tpu.transpose %53, [1, 0] : vector<8x256xf32> -> vector<256x8xf32>
    %55 = vector.extract_strided_slice %54 {offsets = [0, 0], sizes = [256, 7], strides = [1, 1]} : vector<256x8xf32> to vector<256x7xf32>
    %c0_23 = arith.constant 0 : index
    %c0_24 = arith.constant 0 : index
    %c0_25 = arith.constant 0 : index
    %c0_26 = arith.constant 0 : index
    %56 = vector.load %arg4[%c0_23, %c0_24, %c0_25, %c0_26] : memref<1x1x256x7xf32, #tpu.memory_space<vmem>>, vector<1x1x256x7xf32>
    %57 = vector.shape_cast %56 : vector<1x1x256x7xf32> to vector<256x7xf32>
    %58 = vector.shape_cast %55 : vector<256x7xf32> to vector<1x1x256x7xf32>
    tpu.vector_store %arg4[%c0_23, %c0_24, %c0_25, %c0_26], %58 {strides = array<i32>} : memref<1x1x256x7xf32, #tpu.memory_space<vmem>>, vector<1x1x256x7xf32>,
    return
  }
  func.func @transform_0(%arg0: i32, %arg1: i32) -> (i32, i32, i32, i32) {
    %c0_i32 = arith.constant 0 : i32
    %c0_i32_0 = arith.constant 0 : i32
    %c0_i32_1 = arith.constant 0 : i32
    return %arg0, %arg1, %c0_i32, %c0_i32_0 : i32, i32, i32, i32
  }
  func.func @transform_1(%arg0: i32, %arg1: i32) -> (i32, i32) {
    %c0_i32 = arith.constant 0 : i32
    %c0_i32_0 = arith.constant 0 : i32
    %c0_i32_1 = arith.constant 0 : i32
    return %c0_i32, %c0_i32_0 : i32, i32
  }
  func.func @transform_2(%arg0: i32, %arg1: i32) -> (i32, i32, i32, i32) {
    %c0_i32 = arith.constant 0 : i32
    %c0_i32_0 = arith.constant 0 : i32
    %c0_i32_1 = arith.constant 0 : i32
    return %arg0, %arg1, %c0_i32, %c0_i32_0 : i32, i32, i32, i32
  }
}

</mosaic_0001>

<bundles_post_ra>
// kernel: tpu_custom_call.1
= control target key start
LH: loop header
LB: loop body
LE: loop exit
PB: predicated region body
PF: predicated region fallthrough
CT: control target
= control target key end

     0   :  { %s579_s9 = smov 0   ;;  %s581_s10 = smov 0   ;;  %s740_s0 = inlined_call_operand.vmem [shape: f32[2,3,7,256], index: 0, kind: input, shape index: {}]   ;;  %s741_s1 = inlined_call_operand.vmem [shape: f32[2,256], index: 1, kind: input, shape index: {}]   ;;  %s742_s2 = inlined_call_operand.vmem [shape: f32[2,3,256,7], index: 2, kind: output, shape index: {}]  }
   0x1   :  { %s583_s11 = smov 0   ;;  %s585_s12 = smov 0  }
   0x2   :  { %s587_s13 = smov 0  }
   0x3 LB: > { %s21_s14 = sadd.s32 1, %s553_s11  ;;  %s24_s15 = sadd.s32 1, %s557_s12  ;;  %s561_s13 = sphi %s587_s13, %s12_s13   ;;  %s557_s12 = sphi %s585_s12, %s748_s12   ;;  %s553_s11 = sphi %s583_s11, %s747_s11   ;;  %s549_s10 = sphi %s581_s10, %s746_s10   ;;  %s545_s9 = sphi %s579_s9, %s745_s9  }
   0x4   : > { %p22_p0 = scmp.ge.s32.totalorder %s21_s14, 3  ;;  %p464_p1 = scmp.ge.s32.totalorder %s561_s13, 1 }
   0x5   : > { %p132_p2 = scmp.lt.s32.totalorder %s561_s13, 7 }
   0x6   : > { %s750_s14 = smov (%p22_p0, %s21_s14), 0  ;;  %s752_s15 = smov (!%p22_p0, %s24_s15), %s557_s12 }
   0x7   : > { %p133_p3 = pnand %p464_p1, %p132_p2  ;;  %p26_p4 = scmp.ge.s32.totalorder %s752_s15, 2 }
   0x8   : > { %p162_p5 = scmp.lt.s32.totalorder (!%p133_p3), %s549_s10, 1  ;;  %p164_p6 = scmp.lt.s32.totalorder (!%p133_p3), %s545_s9, 2  ;;  %v189_v0 = vlaneseq (!%p133_p3)  ;;  %v188_v4 = vld [vmem:[%s741_s1] sm:$0xf] (!%p133_p3)  ;;  %v563_v34 = vmov (!%p133_p3), 1.0   ;;  %vm265_vm7 = vcmask (!%p133_p3), 1046528  }
   0x9   : > { %s754_s15 = smov (%p26_p4, %s752_s15), 0  ;;  %136 = sbr.rel (%p133_p3) target bundleno = 313 (0x139), region = 28 }
   0xa   : > { %v612_v1 = vshrl.u32 (!%p133_p3), %v189_v0, 7  ;;  %p180_p7 = scmp.eq.s32.totalorder (!%p133_p3), %s545_s9, 1  ;;  %p183_p8 = scmp.eq.s32.totalorder (!%p133_p3), %s545_s9, 0  ;;  %vm332_vm8 = vcmask (!%p133_p3), 56320  }
   0xc   : > { %vm191_vm0 = vcmp.ge.s32.totalorder (!%p133_p3), %v612_v1, 2  ;;  %vm192_vm1 = vcmp.le.s32.totalorder (!%p133_p3), %v612_v1, 3  ;;  %v223_v2 = vsub.s32 (!%p133_p3), 3, %v612_v1  ;;  %v243_v3 = vsub.s32 (!%p133_p3), 2, %v612_v1 }
   0xd   : > { %v219_v5 = vsub.s32 (!%p133_p3), 1, %v612_v1  ;;  %vm628_vm2 = vmand (!%p133_p3), %vm191_vm0, %vm192_vm1  ;;  %v239_v11 = vsub.s32 (!%p133_p3), 0, %v612_v1  ;;  %vm215_vm3 = vcmp.eq.s32.totalorder (!%p133_p3), %v612_v1, 1  ;;  %vm214_vm4 = vcmp.eq.s32.totalorder (!%p133_p3), %v612_v1, 0 }
   0xe   : > { %v224_v6 = vrot.slane (!%p133_p3), %v188_v4, %v223_v2  ;;  %v244_v7 = vrot.slane (!%p133_p3), %v188_v4, %v243_v3  ;;  %vm208_vm5 = vcmp.eq.s32.totalorder (!%p133_p3), %v612_v1, 2  ;;  %vm212_vm6 = vcmp.le.s32.totalorder (!%p133_p3), %v612_v1, 1 }
   0xf   : > { %v220_v25 = vrot.slane (!%p133_p3), %v188_v4, %v219_v5  ;;  %v240_v27 = vrot.slane (!%p133_p3), %v188_v4, %v239_v11  ;;  %v213_v35 = vsel (!%p133_p3), %vm212_vm6, 26.0, %v563_v34 }
  0x10   : > { %s756_s10 = smov (!%p162_p5, %s549_s10), 1  ;;  %v234_v14 = vrot.slane %v224_v6, %v219_v5  ;;  %v254_v15 = vrot.slane %v244_v7, %v239_v11 }
  0x11   : > { %s165_s16 = scalar_select %p164_p6, %s545_s9, 2  ;;  %v230_v28 = vrot.slane %v220_v25, %v219_v5  ;;  %v250_v31 = vrot.slane %v240_v27, %v239_v11 }
  0x12   : > { %s471_s17 = smul.u32 6, %s756_s10  ;;  %v236_v18 = vsel %vm215_vm3, %v234_v14, 0.0 }
  0x13   : > { %s465_s18 = sshll.u32 %s165_s16, 1  ;;  %s467_s19 = sshll.u32 %s165_s16, 5  ;;  %v256_v21 = vsel %vm214_vm4, %v254_v15, %v236_v18  ;;  %v235_v32 = vsel %vm215_vm3, %v230_v28, 0.0 }
  0x14   : > { %s168_s20 = sadd.s32 %s471_s17, %s465_s18  ;;  %s472_s21 = smul.u32 96, %s756_s10  ;;  %v255_v37 = vsel %vm214_vm4, %v250_v31, %v235_v32 }
  0x15   : > { %s466_s22 = sshll.u32 %s168_s20, 3 }
  0x16   : > { %s170_s27 = scalar_lea.vmem %s740_s0, %s466_s22  ;;  %s626_s28 = sadd.s32 %s472_s21, %s467_s19 }
  0x17   : > { %v186_v8 = vld [vmem:[%s170_s27] sm:$0x7f]  ;;  %v187_v9 = vld [vmem:[%s170_s27 + $0x8] sm:$0x7f]  ;;  %s181_s29 = scalar_select %p180_p7, 16.0, 33.0 }
  0x18   : > { %v194_v12 = vsub.f32 0.0, %v186_v8  ;;  %v195_v13 = vsub.f32 0.0, %v187_v9  ;;  %s182_s30 = scalar_select %p180_p7, 30.0, 23.0 }
  0x19   : > { %s758_s29 = smov (%p183_p8, %s181_s29), 10.0  ;;  %s468_s3 = sshll.u32 %s626_s28, 3 }
  0x1a   : > { %v196_v16 = vsel %vm628_vm2, %v186_v8, %v194_v12  ;;  %v197_v17 = vsel %vm628_vm2, %v187_v9, %v195_v13  ;;  %s760_s30 = smov (%p183_p8, %s182_s30), 13.0  ;;  %v209_v29 = vstv %s758_s29  ;;  %s659_s6 = scalar_lea.vmem %s742_s2, %s468_s3 }
  0x1b   : > { %v198_v19 = vmul.f32 1.442695, %v196_v16  ;;  %v200_v20 = vmul.f32 1.442695, %v197_v17  ;;  %v210_v30 = vstv %s760_s30 }
  0x1c   : > { %v211_v33 = vsel %vm208_vm5, %v209_v29, %v210_v30 }
  0x1d   : > { %515 = vpow2.f32 %v198_v19 }
  0x1e   : > { %517 = vpow2.f32 %v200_v20 }
  0x27   : > { %v516_v22 = vpop.eup %515 }
  0x28   : > { %v518_v23 = vpop.eup %517  ;;  %v202_v24 = vadd.f32 1.0, %v516_v22  ;;  %v257_v39 = vmul.f32 %v516_v22, %v211_v33 }
  0x29   : > { %v203_v26 = vadd.f32 1.0, %v518_v23  ;;  %v258_v41 = vmul.f32 %v518_v23, %v211_v33 }
  0x2a   : > { %519 = vrcp.f32 %v202_v24 }
  0x2b   : > { %521 = vrcp.f32 %v203_v26 }
  0x34   : > { %v520_v36 = vpop.eup %519 }
  0x35   : > { %v522_v38 = vpop.eup %521  ;;  %v259_v40 = vmul.f32 %v520_v36, %v213_v35 }
  0x36   : > { %v260_v42 = vmul.f32 %v522_v38, %v213_v35 }
  0x37   : > { %v261_v43 = vadd.f32 %v259_v40, %v255_v37 }
  0x38   : > { %v262_v44 = vadd.f32 %v260_v42, %v256_v21 }
  0x39   : > { %v263_v45 = vsel %vm628_vm2, %v257_v39, %v261_v43 }
  0x3a   : > { %v266_v46 = vsel %vm265_vm7, %v263_v45, 0.0  ;;  %v264_v47 = vsel %vm628_vm2, %v258_v41, %v262_v44 }
  0x3b   : > { %268 = vxpose.xlu0.b32.start.end [1/1] (short) %v266_v46, 128  ;;  %v267_v48 = vsel %vm265_vm7, %v264_v47, 0.0 }
  0x78   : > { %300 = vxpose.xlu0.b32.start.end [1/1] (short) %v267_v48, 128 }
  0xbb   : > { %v284_v49 = vpop.trf.xlu0 }
  0xbc   : > { %333 = vst.msk [vmem:[%s659_s6] sm:$0xff] %vm332_vm8, %v284_v49 }
  0xbf   : > { %v285_v50 = vpop.trf.xlu0 }
  0xc0   : > { %334 = vst.msk [vmem:[%s659_s6 + $0x8] sm:$0xff] %vm332_vm8, %v285_v50 }
  0xc3   : > { %v286_v51 = vpop.trf.xlu0 }
  0xc4   : > { %335 = vst.msk [vmem:[%s659_s6 + $0x10] sm:$0xff] %vm332_vm8, %v286_v51 }
  0xc7   : > { %v287_v52 = vpop.trf.xlu0 }
  0xc8   : > { %336 = vst.msk [vmem:[%s659_s6 + $0x18] sm:$0xff] %vm332_vm8, %v287_v52 }
  0xcb   : > { %v288_v53 = vpop.trf.xlu0 }
  0xcc   : > { %337 = vst.msk [vmem:[%s659_s6 + $0x20] sm:$0xff] %vm332_vm8, %v288_v53 }
  0xcf   : > { %v289_v54 = vpop.trf.xlu0 }
  0xd0   : > { %338 = vst.msk [vmem:[%s659_s6 + $0x28] sm:$0xff] %vm332_vm8, %v289_v54 }
  0xd3   : > { %v290_v55 = vpop.trf.xlu0 }
  0xd4   : > { %339 = vst.msk [vmem:[%s659_s6 + $0x30] sm:$0xff] %vm332_vm8, %v290_v55 }
  0xd7   : > { %v291_v56 = vpop.trf.xlu0 }
  0xd8   : > { %340 = vst.msk [vmem:[%s659_s6 + $0x38] sm:$0xff] %vm332_vm8, %v291_v56 }
  0xdb   : > { %v292_v57 = vpop.trf.xlu0 }
  0xdc   : > { %341 = vst.msk [vmem:[%s659_s6 + $0x40] sm:$0xff] %vm332_vm8, %v292_v57 }
  0xdf   : > { %v293_v58 = vpop.trf.xlu0 }
  0xe0   : > { %342 = vst.msk [vmem:[%s659_s6 + $0x48] sm:$0xff] %vm332_vm8, %v293_v58 }
  0xe3   : > { %v294_v59 = vpop.trf.xlu0 }
  0xe4   : > { %343 = vst.msk [vmem:[%s659_s6 + $0x50] sm:$0xff] %vm332_vm8, %v294_v59 }
  0xe7   : > { %v295_v60 = vpop.trf.xlu0 }
  0xe8   : > { %344 = vst.msk [vmem:[%s659_s6 + $0x58] sm:$0xff] %vm332_vm8, %v295_v60 }
  0xeb   : > { %v296_v61 = vpop.trf.xlu0 }
  0xec   : > { %345 = vst.msk [vmem:[%s659_s6 + $0x60] sm:$0xff] %vm332_vm8, %v296_v61 }
  0xef   : > { %v297_v62 = vpop.trf.xlu0 }
  0xf0   : > { %346 = vst.msk [vmem:[%s659_s6 + $0x68] sm:$0xff] %vm332_vm8, %v297_v62 }
  0xf3   : > { %v298_v63 = vpop.trf.xlu0 }
  0xf4   : > { %347 = vst.msk [vmem:[%s659_s6 + $0x70] sm:$0xff] %vm332_vm8, %v298_v63 }
  0xf7   : > { %v299_v0 = vpop.trf.xlu0 }
  0xf8   : > { %348 = vst.msk [vmem:[%s659_s6 + $0x78] sm:$0xff] %vm332_vm8, %v299_v0 }
  0xfb   : > { %v316_v1 = vpop.trf.xlu0 }
  0xfc   : > { %349 = vst.msk [vmem:[%s659_s6 + $0x80] sm:$0xff] %vm332_vm8, %v316_v1 }
  0xff   : > { %v317_v2 = vpop.trf.xlu0 }
 0x100   : > { %350 = vst.msk [vmem:[%s659_s6 + $0x88] sm:$0xff] %vm332_vm8, %v317_v2 }
 0x103   : > { %v318_v3 = vpop.trf.xlu0 }
 0x104   : > { %351 = vst.msk [vmem:[%s659_s6 + $0x90] sm:$0xff] %vm332_vm8, %v318_v3 }
 0x107   : > { %v319_v4 = vpop.trf.xlu0 }
 0x108   : > { %352 = vst.msk [vmem:[%s659_s6 + $0x98] sm:$0xff] %vm332_vm8, %v319_v4 }
 0x10b   : > { %v320_v5 = vpop.trf.xlu0 }
 0x10c   : > { %353 = vst.msk [vmem:[%s659_s6 + $0xa0] sm:$0xff] %vm332_vm8, %v320_v5 }
 0x10f   : > { %v321_v6 = vpop.trf.xlu0 }
 0x110   : > { %354 = vst.msk [vmem:[%s659_s6 + $0xa8] sm:$0xff] %vm332_vm8, %v321_v6 }
 0x113   : > { %v322_v7 = vpop.trf.xlu0 }
 0x114   : > { %355 = vst.msk [vmem:[%s659_s6 + $0xb0] sm:$0xff] %vm332_vm8, %v322_v7 }
 0x117   : > { %v323_v8 = vpop.trf.xlu0 }
 0x118   : > { %356 = vst.msk [vmem:[%s659_s6 + $0xb8] sm:$0xff] %vm332_vm8, %v323_v8 }
 0x11b   : > { %v324_v9 = vpop.trf.xlu0 }
 0x11c   : > { %357 = vst.msk [vmem:[%s659_s6 + $0xc0] sm:$0xff] %vm332_vm8, %v324_v9 }
 0x11f   : > { %v325_v10 = vpop.trf.xlu0 }
 0x120   : > { %358 = vst.msk [vmem:[%s659_s6 + $0xc8] sm:$0xff] %vm332_vm8, %v325_v10 }
 0x123   : > { %v326_v11 = vpop.trf.xlu0 }
 0x124   : > { %359 = vst.msk [vmem:[%s659_s6 + $0xd0] sm:$0xff] %vm332_vm8, %v326_v11 }
 0x127   : > { %v327_v12 = vpop.trf.xlu0 }
 0x128   : > { %360 = vst.msk [vmem:[%s659_s6 + $0xd8] sm:$0xff] %vm332_vm8, %v327_v12 }
 0x12b   : > { %v328_v13 = vpop.trf.xlu0 }
 0x12c   : > { %361 = vst.msk [vmem:[%s659_s6 + $0xe0] sm:$0xff] %vm332_vm8, %v328_v13 }
 0x12f   : > { %v329_v14 = vpop.trf.xlu0 }
 0x130   : > { %362 = vst.msk [vmem:[%s659_s6 + $0xe8] sm:$0xff] %vm332_vm8, %v329_v14 }
 0x133   : > { %v330_v15 = vpop.trf.xlu0 }
 0x134   : > { %363 = vst.msk [vmem:[%s659_s6 + $0xf0] sm:$0xff] %vm332_vm8, %v330_v15 }
 0x137   : > { %v331_v16 = vpop.trf.xlu0 }
 0x138   : > { %364 = vst.msk [vmem:[%s659_s6 + $0xf8] sm:$0xff] %vm332_vm8, %v331_v16 }
 0x139 PF: > { %s12_s13 = sadd.s32 1, %s561_s13   ;;  %s745_s9 = smov %s553_s11 }
 0x13a   : > { %p9_p9 = scmp.ge.s32.totalorder %s12_s13, 8   ;;  %s746_s10 = smov %s557_s12 }
 0x13b   : > { %s747_s11 = smov %s750_s14  ;;  %s748_s12 = smov %s754_s15 }
 0x13c   :  { %11 = sbr.rel (!%p9_p9) target bundleno = 3 (0x3), region = 58 }

</bundles_post_ra>
